<compile_context>
chip_gen: v6e
topology: v6e:2x2x1
jax: 0.10.0
libtpu: 0.0.40
codegen_flags: <defaults>
</compile_context>

<pallas_src>
import functools

import jax
import jax.numpy as jnp
from jax import lax
from jax.experimental import pallas as pl
from jax.experimental.pallas import tpu as pltpu

HIDDEN = 64        # logical hidden size (matches the torch module)
HIDDEN_PAD = 128   # hidden padded to one full vreg lane width
LANES = 128
MAX_TILE_B = 2048  # big tiles: per-step compute is tiny vs ~0.35us step overhead


def _round_up(n, m):
    return ((n + m - 1) // m) * m


def _value_kernel(x_ref, p_ref, o_ref, *, s8, r_w2, r_w3, r_b3, r_b1, r_b2, h):
    """Fused fc1+ReLU -> fc2+ReLU -> fc3 for one batch tile."""
    # x arrives in caller dtype (f32); cast to bf16 here, right before the MXU.
    x = x_ref[...].astype(jnp.bfloat16)                    # (TB, S8) bf16

    # ---- fc1 + ReLU : bf16 MXU, f32 accumulation -------------------------
    w1 = p_ref[0:s8, :]                                    # (S8, 128) bf16
    h1 = jnp.dot(x, w1, preferred_element_type=jnp.float32)
    b1 = p_ref[r_b1:r_b1 + 1, :].astype(jnp.float32)       # (1, 128)
    h1 = jnp.maximum(h1 + b1, 0.0)                         # f32 elementwise

    # ---- fc2 + ReLU : bf16 MXU, f32 accumulation -------------------------
    w2 = p_ref[r_w2:r_w2 + h, :]                           # (128, 128) bf16
    h2 = jnp.dot(h1.astype(w2.dtype), w2,
                 preferred_element_type=jnp.float32)
    b2 = p_ref[r_b2:r_b2 + 1, :].astype(jnp.float32)       # (1, 128)
    h2 = jnp.maximum(h2 + b2, 0.0)                         # (TB, 128) f32

    # ---- fc3 : lane-dense (1, TB) result; scalar b3 added AFTER reduction --
    w3 = p_ref[r_w3:r_w3 + 1, :]                           # (1, 128) bf16, zero-padded
    out_row = lax.dot_general(                             # w3 . h2^T  -> (1, TB)
        w3, h2.astype(w3.dtype),
        dimension_numbers=(((1,), (1,)), ((), ())),
        preferred_element_type=jnp.float32)
    b3 = p_ref[r_b3:r_b3 + 1, 0:1].astype(jnp.float32)     # (1, 1) scalar bias
    o_ref[...] = (out_row + b3)[None].astype(o_ref.dtype)  # (1, 1, TB) lane-dense store


def pack_params(params, state_space, action_space, dtype=jnp.bfloat16):
    """Pack w1,b1,w2,b2,w3,b3 into ONE lane-dense (rows, 128) slab.

    Row layout (S8 = state_space rounded up to 8; every segment 8-row aligned):
      [0       : S)        w1  (S, 64)   -> cols 0:64   (rows S:S8 zero)
      [S8      : S8+128)   w2  rows 0:64 hold (64, A), cols 0:A (rest zero)
      [S8+128]             w3  row, cols 0:A
      [S8+136]             b3  scalar at lane 0
      [S8+144]             b1  cols 0:64
      [S8+152]             b2  cols 0:A
    total rows = S8 + 160
    """
    s, a = state_space, action_space
    s8 = _round_up(s, 8)
    r_w2 = s8
    r_w3 = s8 + HIDDEN_PAD
    r_b3, r_b1, r_b2 = r_w3 + 8, r_w3 + 16, r_w3 + 24
    n_rows = s8 + HIDDEN_PAD + 32

    slab = jnp.zeros((n_rows, LANES), jnp.float32)
    slab = slab.at[0:s, 0:HIDDEN].set(params["w1"])
    slab = slab.at[r_w2:r_w2 + HIDDEN, 0:a].set(params["w2"])
    slab = slab.at[r_w3, 0:a].set(params["w3"][:, 0])
    slab = slab.at[r_b3, 0].set(params["b3"])
    slab = slab.at[r_b1, 0:HIDDEN].set(params["b1"])
    slab = slab.at[r_b2, 0:a].set(params["b2"])
    return slab.astype(dtype)


def value_forward(x, packed, *, tile_b=None):
    """x: [B, state_space] (f32). packed: slab from pack_params. Returns [B, 1] f32."""
    b, s = x.shape
    s8 = _round_up(s, 8)
    h = HIDDEN_PAD
    r_w2 = s8
    r_w3 = s8 + h
    r_b3, r_b1, r_b2 = r_w3 + 8, r_w3 + 16, r_w3 + 24
    assert packed.shape == (s8 + h + 32, LANES), packed.shape

    # Batch tiling: big tiles (grid steps are pure fixed overhead here), and at
    # least 2 blocks for B >= 16 so v7x's two TensorCores both engage.
    if tile_b is None:
        if b >= 16:
            tile_b = min(MAX_TILE_B, _round_up((b + 1) // 2, 8))
        else:
            tile_b = _round_up(max(b, 1), 8)
    b_pad = _round_up(b, tile_b)
    n_blocks = b_pad // tile_b

    # Keep caller dtype (no extra f32->bf16 HBM pass); pad batch/feature if needed.
    x_p = x
    if b_pad != b or s8 != s:
        x_p = jnp.pad(x_p, ((0, b_pad - b), (0, s8 - s)))

    cost = pl.CostEstimate(
        flops=2 * b_pad * (s8 * h + h * h + h),
        transcendentals=0,
        bytes_accessed=(x_p.size * x_p.dtype.itemsize
                        + packed.size * packed.dtype.itemsize
                        + b_pad * 4),
    )

    kernel = functools.partial(
        _value_kernel,
        s8=s8, r_w2=r_w2, r_w3=r_w3, r_b3=r_b3, r_b1=r_b1, r_b2=r_b2, h=h)

    out = pl.pallas_call(
        kernel,
        out_shape=jax.ShapeDtypeStruct((n_blocks, 1, tile_b), jnp.float32),
        grid=(n_blocks,),
        in_specs=[
            pl.BlockSpec((tile_b, s8), lambda i: (i, 0)),    # stream x tiles
            pl.BlockSpec(packed.shape, lambda i: (0, 0)),    # params VMEM-resident
        ],
        out_specs=pl.BlockSpec((1, 1, tile_b), lambda i: (i, 0, 0)),  # lane-dense
        compiler_params=pltpu.CompilerParams(
            dimension_semantics=("parallel",)),              # megacore on v7x
        cost_estimate=cost,
    )(x_p, packed)
    # (n_blocks, 1, tile_b) -> (b_pad, 1); padded rows are garbage, slice them off.
    return out.reshape(b_pad, 1)[:b]


def init_params(key, state_space, action_space, hidden=HIDDEN):
    """Matches the torch module's init_weights(): W ~ Normal(0,1), biases = 0.
    Weights stored as [in, out] (transpose of torch's [out, in])."""
    k1, k2, k3 = jax.random.split(key, 3)
    return {
        "w1": jax.random.normal(k1, (state_space, hidden), jnp.float32),
        "b1": jnp.zeros((hidden,), jnp.float32),
        "w2": jax.random.normal(k2, (hidden, action_space), jnp.float32),
        "b2": jnp.zeros((action_space,), jnp.float32),
        "w3": jax.random.normal(k3, (action_space, 1), jnp.float32),
        "b3": jnp.zeros((), jnp.float32),
    }


def value_ref(x, params):
    """Pure-JAX reference mirroring the kernel's bf16-storage / f32-accum math."""
    bf = lambda a: a.astype(jnp.bfloat16)
    f32 = lambda a: a.astype(jnp.float32)
    h1 = jnp.dot(bf(x), bf(params["w1"]), preferred_element_type=jnp.float32)
    h1 = jnp.maximum(h1 + f32(bf(params["b1"])), 0.0)
    h2 = jnp.dot(bf(h1), bf(params["w2"]), preferred_element_type=jnp.float32)
    h2 = jnp.maximum(h2 + f32(bf(params["b2"])), 0.0)
    out = jnp.dot(bf(h2), bf(params["w3"]), preferred_element_type=jnp.float32)
    return out + f32(bf(params["b3"]))


if __name__ == "__main__":
    key = jax.random.PRNGKey(0)
    k_param, k_b1, k_b2, k_x = jax.random.split(key, 4)

    batch = 8
    state_space = 16
    action_space = 4

    params = init_params(k_param, state_space, action_space)
    # The torch init zeroes biases, which would hide a wrong bias-row offset in the
    # packed slab -- use nonzero biases for the self-test so every path is exercised.
    params["b1"] = 2.0 * jax.random.normal(k_b1, (HIDDEN,), jnp.float32)
    params["b2"] = 2.0 * jax.random.normal(k_b2, (action_space,), jnp.float32)
    params["b3"] = jnp.asarray(2.5, jnp.float32)

    packed = pack_params(params, state_space, action_space)   # one-time prep
    x = jax.random.normal(k_x, (batch, state_space), jnp.float32)

    out = jax.block_until_ready(value_forward(x, packed))

    ref = value_ref(x, params)
    assert out.shape == (batch, 1), out.shape
    # bf16 parameter/activation storage; reference mirrors the same quantization,
    # so only MXU accumulation-order noise remains.
    assert jnp.allclose(out, ref, atol=1e-1, rtol=1e-2), (
        "mismatch vs reference, max abs err = "
        f"{float(jnp.max(jnp.abs(out - ref)))}")

    print("KERNEL_OK")
</pallas_src>

<mosaic_0001>
module attributes {stable_mosaic.version = 11 : i64} {
  func.func @_value_kernel(%arg0: i32, %arg1: memref<8x16xf32, #tpu.memory_space<vmem>>, %arg2: memref<176x128xbf16, #tpu.memory_space<vmem>>, %arg3: memref<1x1x8xf32, #tpu.memory_space<vmem>>) attributes {dimension_semantics = [#tpu.dimension_semantics<parallel>], iteration_bounds = array<i64: 1>, scalar_prefetch = 0 : i64, scratch_operands = 0 : i64, tpu.core_type = #tpu.core_type<tc>, window_params = [{transform_indices = @transform_0, window_bounds = array<i64: 8, 16>}, {pipeline_mode = #tpu.pipeline_mode<synchronous>, transform_indices = @transform_1, window_bounds = array<i64: 176, 128>}, {transform_indices = @transform_2, window_bounds = array<i64: 1, 1, 8>}]} {
    %c0 = arith.constant 0 : index
    %c0_0 = arith.constant 0 : index
    %0 = vector.load %arg1[%c0, %c0_0] : memref<8x16xf32, #tpu.memory_space<vmem>>, vector<8x16xf32>
    %1 = arith.truncf %0 : vector<8x16xf32> to vector<8x16xbf16>
    %c0_1 = arith.constant 0 : index
    %c0_2 = arith.constant 0 : index
    %2 = vector.load %arg2[%c0_1, %c0_2] : memref<176x128xbf16, #tpu.memory_space<vmem>>, vector<16x128xbf16>
    %cst = arith.constant dense<0.000000e+00> : vector<8x128xf32>
    %3 = tpu.matmul %1, %2, %cst {dimension_numbers = #tpu.dot_dimension_numbers<[1], [0], [0], [1], [0, 0, 1, 1], [], []>} : vector<8x16xbf16>, vector<16x128xbf16>, vector<8x128xf32> -> vector<8x128xf32>
    %c160 = arith.constant 160 : index
    %c0_3 = arith.constant 0 : index
    %4 = vector.load %arg2[%c160, %c0_3] : memref<176x128xbf16, #tpu.memory_space<vmem>>, vector<1x128xbf16>
    %5 = arith.extf %4 : vector<1x128xbf16> to vector<1x128xf32>
    %6 = vector.broadcast %5 : vector<1x128xf32> to vector<8x128xf32>
    %7 = arith.addf %3, %6 : vector<8x128xf32>
    %cst_4 = arith.constant 0.000000e+00 : f32
    %8 = vector.broadcast %cst_4 : f32 to vector<8x128xf32>
    %9 = arith.maximumf %7, %8 : vector<8x128xf32>
    %c16 = arith.constant 16 : index
    %c0_5 = arith.constant 0 : index
    %10 = vector.load %arg2[%c16, %c0_5] : memref<176x128xbf16, #tpu.memory_space<vmem>>, vector<128x128xbf16>
    %11 = arith.truncf %9 : vector<8x128xf32> to vector<8x128xbf16>
    %cst_6 = arith.constant dense<0.000000e+00> : vector<8x128xf32>
    %12 = tpu.matmul %11, %10, %cst_6 {dimension_numbers = #tpu.dot_dimension_numbers<[1], [0], [0], [1], [0, 0, 1, 1], [], []>} : vector<8x128xbf16>, vector<128x128xbf16>, vector<8x128xf32> -> vector<8x128xf32>
    %c168 = arith.constant 168 : index
    %c0_7 = arith.constant 0 : index
    %13 = vector.load %arg2[%c168, %c0_7] : memref<176x128xbf16, #tpu.memory_space<vmem>>, vector<1x128xbf16>
    %14 = arith.extf %13 : vector<1x128xbf16> to vector<1x128xf32>
    %15 = vector.broadcast %14 : vector<1x128xf32> to vector<8x128xf32>
    %16 = arith.addf %12, %15 : vector<8x128xf32>
    %cst_8 = arith.constant 0.000000e+00 : f32
    %17 = vector.broadcast %cst_8 : f32 to vector<8x128xf32>
    %18 = arith.maximumf %16, %17 : vector<8x128xf32>
    %c144 = arith.constant 144 : index
    %c0_9 = arith.constant 0 : index
    %19 = vector.load %arg2[%c144, %c0_9] : memref<176x128xbf16, #tpu.memory_space<vmem>>, vector<1x128xbf16>
    %20 = arith.truncf %18 : vector<8x128xf32> to vector<8x128xbf16>
    %cst_10 = arith.constant dense<0.000000e+00> : vector<1x8xf32>
    %21 = tpu.matmul %19, %20, %cst_10 {dimension_numbers = #tpu.dot_dimension_numbers<[1], [1], [0], [0], [0, 0, 1, 0], [], []>} : vector<1x128xbf16>, vector<8x128xbf16>, vector<1x8xf32> -> vector<1x8xf32>
    %c152 = arith.constant 152 : index
    %c0_11 = arith.constant 0 : index
    %22 = vector.load %arg2[%c152, %c0_11] : memref<176x128xbf16, #tpu.memory_space<vmem>>, vector<1x1xbf16>
    %23 = arith.extf %22 : vector<1x1xbf16> to vector<1x1xf32>
    %24 = vector.broadcast %23 : vector<1x1xf32> to vector<1x8xf32>
    %25 = arith.addf %21, %24 : vector<1x8xf32>
    %26 = vector.shape_cast %25 : vector<1x8xf32> to vector<1x1x8xf32>
    %c0_12 = arith.constant 0 : index
    %c0_13 = arith.constant 0 : index
    %c0_14 = arith.constant 0 : index
    %27 = vector.load %arg3[%c0_12, %c0_13, %c0_14] : memref<1x1x8xf32, #tpu.memory_space<vmem>>, vector<1x1x8xf32>
    tpu.vector_store %arg3[%c0_12, %c0_13, %c0_14], %26 {strides = array<i32>} : memref<1x1x8xf32, #tpu.memory_space<vmem>>, vector<1x1x8xf32>,
    return
  }
  func.func @transform_0(%arg0: i32) -> (i32, i32) {
    %c0_i32 = arith.constant 0 : i32
    %c0_i32_0 = arith.constant 0 : i32
    return %arg0, %c0_i32 : i32, i32
  }
  func.func @transform_1(%arg0: i32) -> (i32, i32) {
    %c0_i32 = arith.constant 0 : i32
    %c0_i32_0 = arith.constant 0 : i32
    %c0_i32_1 = arith.constant 0 : i32
    return %c0_i32, %c0_i32_0 : i32, i32
  }
  func.func @transform_2(%arg0: i32) -> (i32, i32, i32) {
    %c0_i32 = arith.constant 0 : i32
    %c0_i32_0 = arith.constant 0 : i32
    %c0_i32_1 = arith.constant 0 : i32
    return %arg0, %c0_i32, %c0_i32_0 : i32, i32, i32
  }
}

</mosaic_0001>

<bundles_post_ra>
// kernel: tpu_custom_call.1
= control target key start
LH: loop header
LB: loop body
LE: loop exit
PB: predicated region body
PF: predicated region fallthrough
CT: control target
= control target key end

     0   :  { %7 = vsyncpa [#allocation3], 0  ;;  %s450_s0 = inlined_call_operand.hbm [shape: f32[8,16], index: 0, kind: input, shape index: {}]   ;;  %s451_s1 = inlined_call_operand.hbm [shape: bf16[176,128], index: 1, kind: input, shape index: {}]   ;;  %s452_s2 = inlined_call_operand.hbm [shape: f32[1,1,8], index: 2, kind: output, shape index: {}]  }
   0x1   :  { %8 = vsyncpa [#allocation6], 0 }
   0x2   :  { %9 = vsyncpa [#allocation4], 0  ;;  %s418_s9 = smov [#allocation2]   ;;  %s419_s11 = smov [#allocation5]  }
   0x3   :  { %s16_s10 = sshll.u32 %s418_s9, 4  ;;  %s25_s12 = sshll.u32 %s419_s11, 4  ;;  %s17_s10 = int_to_ptr.vmem [resolvable:$true] %s16_s10  ;;  %s26_s12 = int_to_ptr.vmem [resolvable:$true] %s25_s12 }
   0x4   :  { %s360_s13 = scalar_lea.vmem %s17_s10, 128  ;;  %p365_p1 = scmp.lt.s32.totalorder %s17_s10, %s17_s10 }
   0x5   :  { %p361_p0 = scmp.ne.s32.totalorder %s17_s10, %s360_s13  ;;  %p366_p2 = scmp.lt.s32.totalorder %s360_s13, %s360_s13 }
   0x7   :  { %p367_p3 = por %p366_p2, %p365_p1 }
   0x9   :  { %p368_p4 = pnand %p367_p3, %p361_p0 }
   0xb   :  { %371 = shalt.err (!%p368_p4)
}
   0xc   :  { %19 = dma.hbm_to_vmem [thread:$0]  %s450_s0, 128, %s17_s10, [#allocation3]  }
   0xd   :  { %s380_s16 = scalar_lea.vmem %s26_s12, 1408  ;;  %p385_p6 = scmp.lt.s32.totalorder %s26_s12, %s26_s12 }
   0xe   :  { %p381_p5 = scmp.ne.s32.totalorder %s26_s12, %s380_s16  ;;  %p386_p7 = scmp.lt.s32.totalorder %s380_s16, %s380_s16 }
  0x10   :  { %p387_p8 = por %p386_p7, %p385_p6 }
  0x12   :  { %p388_p9 = pnand %p387_p8, %p381_p5 }
  0x14   :  { %391 = shalt.err (!%p388_p9)
}
  0x15   :  { %s420_s17 = smov 64   ;;  %s421_s18 = smov 4  }
  0x16   :  { %31 = dma.hbm_to_vmem [thread:$0]  %s451_s1, 1408, %s26_s12, [#allocation6], %s420_s17, %s420_s17, %s421_s18  }
  0x17   :  { %412 = dma.done.wait [#allocation3], 128  }
  0x18   :  { %413 = vsyncadd [#allocation3], 4294967168 }
  0x19   :  { %414 = dma.done.wait [#allocation6], 1408  }
  0x1a   :  { %415 = vsyncadd [#allocation6], 4294965888  ;;  %v422_v0 = vmov 0.0   ;;  %vm423_vm0 = vmmov 0   ;;  %v343_v1 = vld [vmem:[#allocation5] sm:$0xff]   ;;  %v39_v2 = vld [vmem:[#allocation2] sm:$0xff]  ;;  %v45_v12 = vlaneseq }
  0x1b   :  { %302 = vmatprep.subr.bf16.mxu0 %v422_v0  ;;  %304 = vmatprep.mubr.msk.bf16.mxu0 %vm423_vm0, %v422_v0  ;;  %v40_v3 = vpack.c.bf16 %v39_v2, %v39_v2  ;;  %vm55_vm1 = vcmask 130048   ;;  %v344_v4 = vld [vmem:[#allocation5 + $0x40] sm:$0xff]   ;;  %v345_v5 = vld [vmem:[#allocation5 + $0x38] sm:$0xff]   ;;  %v346_v6 = vld [vmem:[#allocation5 + $0x30] sm:$0xff]   ;;  %v424_v26 = vmov 0   ;;  %s425_s0 = smov [#allocation7]  }
  0x1c   :  { %308 = vmatprep.subr.bf16.mxu1 %v422_v0  ;;  %324 = vmatprep.mubr.msk.bf16.mxu1 %vm423_vm0, %v422_v0  ;;  %v347_v7 = vld [vmem:[#allocation5 + $0x28] sm:$0xff]   ;;  %v348_v8 = vld [vmem:[#allocation5 + $0x20] sm:$0xff]   ;;  %v349_v9 = vld [vmem:[#allocation5 + $0x18] sm:$0xff]   ;;  %v46_v13 = vshrl.u32 %v45_v12, 7  ;;  %s269_s1 = sshll.u32 %s425_s0, 4  ;;  %vm261_vm2 = vcmask 57344   ;;  %s270_s1 = int_to_ptr.vmem [resolvable:$true] %s269_s1 }
  0x1d   :  { %303 = vmatpush3.bf16.msra.mxu0 %v343_v1  ;;  %309 = vmatpush3.bf16.msra.mxu1 %v344_v4  ;;  %v350_v10 = vld [vmem:[#allocation5 + $0x10] sm:$0xff]   ;;  %v351_v11 = vld [vmem:[#allocation5 + $0x8] sm:$0xff]   ;;  %s392_s21 = scalar_lea.vmem %s270_s1, 16  ;;  %s396_s22 = scalar_lea.vmem %s270_s1, 32 }
  0x1e   :  { %328 = vmatprep.subr.bf16.mxu0 %v422_v0  ;;  %310 = vmatprep.subr.bf16.mxu1 %v422_v0  ;;  %v43_v14 = vld [vmem:[#allocation5 + $0x50] sm:$0x1]  ;;  %v47_v16 = vsub.s32 0, %v46_v13  ;;  %v214_v25 = vld [vmem:[#allocation5 + $0x4c] sm:$0x1]  ;;  %p393_p10 = scmp.ne.s32.totalorder %s270_s1, %s392_s21  ;;  %p397_p11 = scmp.lt.s32.totalorder %s270_s1, %s270_s1 }
  0x1f   :  { %v44_v15 = vunpack.c.l.bf16 %v43_v14  ;;  %342 = vset.pattern.permute.xlu0 %v424_v26  ;;  %v215_v27 = vunpack.c.l.bf16 %v214_v25  ;;  %v117_v28 = vld [vmem:[#allocation5 + $0x54] sm:$0x1]  ;;  %v212_v38 = vld [vmem:[#allocation5 + $0x48] sm:$0x1]  ;;  %p398_p12 = scmp.lt.s32.totalorder %s396_s22, %s392_s21 }
  0x20   :  { %305 = vmatmul.mubr.msk.bf16.vlgmr.msra.gmra.mxu0 %vm55_vm1, %v40_v3  ;;  %v118_v29 = vunpack.c.l.bf16 %v117_v28 }
  0x21   :  { %330 = vmatprep.mubr.msk.bf16.mxu0 %vm423_vm0, %v422_v0  ;;  %311 = vmatpush3.bf16.msra.mxu1 %v345_v5  ;;  %v48_v17 = vrot.slane %v44_v15, %v47_v16  ;;  %p399_p13 = por %p398_p12, %p397_p11 }
  0x22   :  { %312 = vmatprep.subr.bf16.mxu1 %v422_v0  ;;  %218 = vperm.xlu0 %342, %v215_v27   ;;  %v122_v30 = vrot.slane %v118_v29, %v47_v16 }
  0x23   :  { %p400_p0 = pnand %p399_p13, %p393_p10 }
  0x25   :  { %313 = vmatpush3.bf16.msra.mxu1 %v346_v6 }
  0x26   :  { %314 = vmatprep.subr.bf16.mxu1 %v422_v0 }
  0x29   :  { %315 = vmatpush3.bf16.msra.mxu1 %v347_v7 }
  0x2a   :  { %316 = vmatprep.subr.bf16.mxu1 %v422_v0 }
  0x2d   :  { %317 = vmatpush3.bf16.msra.mxu1 %v348_v8 }
  0x2e   :  { %318 = vmatprep.subr.bf16.mxu1 %v422_v0 }
  0x31   :  { %319 = vmatpush3.bf16.msra.mxu1 %v349_v9 }
  0x32   :  { %320 = vmatprep.subr.bf16.mxu1 %v422_v0 }
  0x35   :  { %321 = vmatpush3.bf16.msra.mxu1 %v350_v10 }
  0x36   :  { %322 = vmatprep.subr.bf16.mxu1 %v422_v0 }
  0x39   :  { %323 = vmatpush3.bf16.msra.mxu1 %v351_v11 }
  0x9d   :  { %v219_v39 = vpop.permute.xlu0 %218 }
  0xe0   :  { %v93_v18 = vpop.f32.mrf.mxu0 }
  0xe1   :  { %v94_v19 = vadd.f32 %v93_v18, %v48_v17 }
  0xe2   :  { %v306_v20 = vpop.f32.mrf.mxu0 }
  0xe3   :  { %v99_v21 = vmax.f32 %v94_v19, 0.0 }
  0xe4   :  { %v96_v22 = vpop.f32.mrf.mxu0 }
  0xe5   :  { %v116_v23 = vpack.c.bf16 %v99_v21, %v99_v21 }
  0xe6   :  { %v307_v24 = vpop.f32.mrf.mxu0 }
  0xe7   :  { %325 = vmatmul.mubr.bf16.vlgmr.msra.gmra.mxu1 %v116_v23 }
 0x1a7   :  { %v205_v31 = vpop.f32.mrf.mxu1 }
 0x1a8   :  { %v206_v32 = vadd.f32 %v205_v31, %v122_v30 }
 0x1a9   :  { %v326_v33 = vpop.f32.mrf.mxu1 }
 0x1aa   :  { %v211_v34 = vmax.f32 %v206_v32, 0.0 }
 0x1ab   :  { %v208_v35 = vpop.f32.mrf.mxu1 }
 0x1ac   :  { %v213_v36 = vpack.c.bf16 %v211_v34, %v211_v34 }
 0x1ad   :  { %v327_v37 = vpop.f32.mrf.mxu1 }
 0x1ae   :  { %329 = vmatpush3.bf16.xpose.msra.mxu0 %v213_v36 }
 0x1b5   :  { %331 = vmatmul.mubr.bf16.vlgmr.msra.gmra.mxu0 %v212_v38 }
 0x275   :  { %v255_v40 = vpop.f32.mrf.mxu0 }
 0x276   :  { %v256_v41 = vadd.f32 %v255_v40, %v219_v39 }
 0x277   :  { %v332_v42 = vpop.f32.mrf.mxu0 }
 0x278   :  { %262 = vst.msk [vmem:[#allocation7] sm:$0x1] %vm261_vm2, %v256_v41 }
 0x279   :  { %v258_v43 = vpop.f32.mrf.mxu0 }
 0x27a   :  { %403 = shalt.err (!%p400_p0)
}
 0x27b   :  { %272 = dma.vmem_to_hbm [thread:$0]  %s270_s1, 16, %s452_s2, [#allocation4]   ;;  %v333_v44 = vpop.f32.mrf.mxu0 }
 0x27c   :  { %416 = dma.done.wait [#allocation4], 16  }
 0x27d   :  { %417 = vsyncadd [#allocation4], 4294967280 }
 0x27e   :  { %276 = vsyncpa [#allocation3], 1 }
 0x27f   :  { %277 = vsyncpa [#allocation6], 1 }
 0x280   :  { %278 = vsyncpa [#allocation4], 1 }

</bundles_post_ra>
